<compile_context>
chip_gen: v7x
topology: tpu7x:2x2x1
jax: 0.10.0
libtpu: 0.0.40
codegen_flags: <defaults>
</compile_context>

<pallas_src>
import functools

import jax
import jax.numpy as jnp
from jax import lax
from jax.experimental import pallas as pl
from jax.experimental.pallas import tpu as pltpu

_LANES = 128
_INT32_MIN = -(2 ** 31)
_INT32_MAX = 2 ** 31 - 1


def _row_reduce(x):
    """(R, S, 128) -> (R, 1, 1) sum, as two single-axis reductions."""
    return jnp.sum(jnp.sum(x, axis=2, keepdims=True), axis=1, keepdims=True)


def _topk_sum_kernel(x_ref, out_ref, *, k, rows):
    """Per-row sum of the k smallest values for a block of `rows` rows.

    x_ref:   (R, S, 128) input dtype -- R full rows, padded with +inf
    out_ref: (R, 1, 128) float32     -- per-row sums broadcast across lanes
    """
    vals = x_ref[...].astype(jnp.float32)              # in-kernel widening cast
    bits = pltpu.bitcast(vals, jnp.int32)
    # Order-preserving map float32 -> int32 (integer compare == float compare).
    keys = jnp.where(bits >= 0, bits, bits ^ jnp.int32(0x7FFFFFFF))

    lo0 = jnp.full((rows, 1, 1), _INT32_MIN, jnp.int32)
    hi0 = jnp.full((rows, 1, 1), _INT32_MAX, jnp.int32)
    cnt0 = jnp.zeros((rows, 1, 1), jnp.int32)           # count(keys < lo) == 0

    # Vectorized (per-row) binary search for the k-th smallest key.
    # Invariant: count(keys <= hi) >= k,  cnt_lo == count(keys < lo) < k.
    def body(_, carry):
        lo, hi, cnt_lo = carry
        mid = (lo >> 1) + (hi >> 1) + (lo & hi & 1)      # overflow-safe floor avg
        cnt = _row_reduce((keys <= mid).astype(jnp.int32))
        pred = cnt >= k
        lo = jnp.where(pred, lo, mid + 1)
        hi = jnp.where(pred, mid, hi)
        cnt_lo = jnp.where(pred, cnt_lo, cnt)            # count(keys <= new_lo - 1)
        return lo, hi, cnt_lo

    t_key, _, cnt_strict = lax.fori_loop(0, 32, body, (lo0, hi0, cnt0))

    # Threshold VALUE reconstructed from its key (inverse bit map) -- no
    # extra full-row masked-max pass.
    t_bits = jnp.where(t_key >= 0, t_key, t_key ^ jnp.int32(0x7FFFFFFF))
    t_val = pltpu.bitcast(t_bits, jnp.float32)           # (R, 1, 1)

    # Exact sum of the k smallest values per row (ties at the threshold
    # handled by the correction term; tie order does not change the sum).
    sum_strict = _row_reduce(jnp.where(keys < t_key, vals, 0.0))
    row_sum = sum_strict + (k - cnt_strict).astype(jnp.float32) * t_val

    out_ref[...] = jnp.broadcast_to(row_sum, out_ref.shape).astype(jnp.float32)


def simple_negative_mining(loss, perc=0.7):
    """Matches SimpleNegativeMining(perc).forward(loss)."""
    B = loss.shape[0]
    flat = loss.reshape(B, -1)                 # keep original dtype (cast in-kernel)
    P = flat.shape[1]
    k = int(perc * P)
    # NOTE: torch yields NaN (mean of empty topk) when int(perc*P) == 0;
    # we clamp to k >= 1 (intentional, documented divergence).
    # NaNs in the input sort above +inf under the int32 key ordering.
    k = max(min(k, P), 1)

    S = pl.cdiv(P, _LANES)
    P_pad = S * _LANES
    if P_pad != P:
        # Only for P % 128 != 0; +inf is never among the k smallest (k <= P).
        # TODO(synk): mask the tail lanes in-kernel (broadcasted_iota) to avoid
        # this extra HBM copy for unaligned P.
        flat = jnp.pad(flat, ((0, 0), (0, P_pad - P)),
                       constant_values=float("inf"))
    x = flat.reshape(B, S, _LANES)             # free reshape, lane-dense rows

    # Rows per grid step: vectorize the search across rows and amortize grid
    # overhead, while keeping the input block ~<=2 MiB so double-buffered
    # input + f32 vals/keys temporaries fit v5e/v7x scoped-VMEM defaults.
    row_bytes = S * _LANES * x.dtype.itemsize
    R = max(1, min(B, max(1, (2 << 20) // max(row_bytes, 1))))
    grid_b = pl.cdiv(B, R)

    # TODO(synk): for rows far beyond a few MiB, switch to a tiled two-pass
    # histogram select over pixel tiles (and split the pixel axis across both
    # v7x TensorCores when B == 1).
    row_sums = pl.pallas_call(
        functools.partial(_topk_sum_kernel, k=k, rows=R),
        out_shape=jax.ShapeDtypeStruct((B, 1, _LANES), jnp.float32),
        grid=(grid_b,),
        in_specs=[pl.BlockSpec((R, S, _LANES), lambda b: (b, 0, 0))],
        out_specs=pl.BlockSpec((R, 1, _LANES), lambda b: (b, 0, 0)),
        compiler_params=pltpu.CompilerParams(
            dimension_semantics=("parallel",)),
    )(x)[:, 0, 0]

    # mean over all B*k selected (smallest) values == -(topk(-loss).mean()).
    return jnp.sum(row_sums) / (B * k)


def _reference(loss, perc=0.7):
    """Pure-JAX mirror of the PyTorch module."""
    B = loss.shape[0]
    flat = loss.reshape(B, -1).astype(jnp.float32)
    P = flat.shape[1]
    k = max(min(int(perc * P), P), 1)
    neg_topk, _ = jax.lax.top_k(-flat, k)
    return -jnp.mean(neg_topk)


if __name__ == "__main__":
    key = jax.random.PRNGKey(0)
    B, C, H, W = 2, 4, 16, 16
    # Per-element loss map, as produced upstream of SimpleNegativeMining.
    loss_map = jax.random.normal(key, (B, C, H, W), dtype=jnp.float32) ** 2

    out = jax.block_until_ready(simple_negative_mining(loss_map, perc=0.7))
    ref = jax.block_until_ready(_reference(loss_map, perc=0.7))
    assert jnp.allclose(out, ref, rtol=1e-5, atol=1e-5), (out, ref)

    print("KERNEL_OK")
</pallas_src>

<mosaic_0001>
module attributes {stable_mosaic.version = 11 : i64} {
  func.func @_topk_sum_kernel(%arg0: i32, %arg1: memref<2x8x128xf32, #tpu.memory_space<vmem>>, %arg2: memref<2x1x128xf32, #tpu.memory_space<vmem>>) attributes {dimension_semantics = [#tpu.dimension_semantics<parallel>], iteration_bounds = array<i64: 1>, scalar_prefetch = 0 : i64, scratch_operands = 0 : i64, tpu.core_type = #tpu.core_type<tc>, window_params = [{transform_indices = @transform_0, window_bounds = array<i64: 2, 8, 128>}, {transform_indices = @transform_1, window_bounds = array<i64: 2, 1, 128>}]} {
    %c0 = arith.constant 0 : index
    %c0_0 = arith.constant 0 : index
    %c0_1 = arith.constant 0 : index
    %0 = vector.load %arg1[%c0, %c0_0, %c0_1] : memref<2x8x128xf32, #tpu.memory_space<vmem>>, vector<2x8x128xf32>
    %1 = tpu.bitcast %0 : vector<2x8x128xf32> -> vector<2x8x128xi32>
    %c0_i32 = arith.constant 0 : i32
    %2 = vector.broadcast %c0_i32 : i32 to vector<2x8x128xi32>
    %3 = arith.cmpi sge, %1, %2 : vector<2x8x128xi32>
    %c2147483647_i32 = arith.constant 2147483647 : i32
    %4 = vector.broadcast %c2147483647_i32 : i32 to vector<2x8x128xi32>
    %5 = arith.xori %1, %4 : vector<2x8x128xi32>
    %6 = arith.select %3, %1, %5 : vector<2x8x128xi1>, vector<2x8x128xi32>
    %c-2147483648_i32 = arith.constant -2147483648 : i32
    %7 = vector.broadcast %c-2147483648_i32 : i32 to vector<2x1x1xi32>
    %c2147483647_i32_2 = arith.constant 2147483647 : i32
    %8 = vector.broadcast %c2147483647_i32_2 : i32 to vector<2x1x1xi32>
    %c0_i32_3 = arith.constant 0 : i32
    %9 = vector.broadcast %c0_i32_3 : i32 to vector<2x1x1xi32>
    %c0_i32_4 = arith.constant 0 : i32
    %c32_i32 = arith.constant 32 : i32
    %10 = arith.addi %c0_i32_4, %c32_i32 : i32
    %c1_i32 = arith.constant 1 : i32
    %11:3 = scf.for %arg3 = %c0_i32_4 to %10 step %c1_i32 iter_args(%arg4 = %7, %arg5 = %8, %arg6 = %9) -> (vector<2x1x1xi32>, vector<2x1x1xi32>, vector<2x1x1xi32>)  : i32 {
      %c1_i32_12 = arith.constant 1 : i32
      %34 = vector.broadcast %c1_i32_12 : i32 to vector<2x1x1xi32>
      %35 = arith.shrsi %arg4, %34 : vector<2x1x1xi32>
      %c1_i32_13 = arith.constant 1 : i32
      %36 = vector.broadcast %c1_i32_13 : i32 to vector<2x1x1xi32>
      %37 = arith.shrsi %arg5, %36 : vector<2x1x1xi32>
      %38 = arith.addi %35, %37 : vector<2x1x1xi32>
      %39 = arith.andi %arg4, %arg5 : vector<2x1x1xi32>
      %c1_i32_14 = arith.constant 1 : i32
      %40 = vector.broadcast %c1_i32_14 : i32 to vector<2x1x1xi32>
      %41 = arith.andi %39, %40 : vector<2x1x1xi32>
      %42 = arith.addi %38, %41 : vector<2x1x1xi32>
      %43 = vector.broadcast %42 : vector<2x1x1xi32> to vector<2x8x128xi32>
      %44 = arith.cmpi sle, %6, %43 : vector<2x8x128xi32>
      %45 = arith.extui %44 : vector<2x8x128xi1> to vector<2x8x128xi32>
      %cst_15 = arith.constant dense<0> : vector<2x8xi32>
      %46 = vector.multi_reduction <add>, %45, %cst_15 [2] : vector<2x8x128xi32> to vector<2x8xi32>
      %47 = vector.shape_cast %46 : vector<2x8xi32> to vector<2x8x1xi32>
      %cst_16 = arith.constant dense<0> : vector<2x1xi32>
      %48 = vector.multi_reduction <add>, %47, %cst_16 [1] : vector<2x8x1xi32> to vector<2x1xi32>
      %49 = vector.shape_cast %48 : vector<2x1xi32> to vector<2x1x1xi32>
      %c716_i32_17 = arith.constant 716 : i32
      %50 = vector.broadcast %c716_i32_17 : i32 to vector<2x1x1xi32>
      %51 = arith.cmpi sge, %49, %50 : vector<2x1x1xi32>
      %c1_i32_18 = arith.constant 1 : i32
      %52 = vector.broadcast %c1_i32_18 : i32 to vector<2x1x1xi32>
      %53 = arith.addi %42, %52 : vector<2x1x1xi32>
      %54 = arith.select %51, %arg4, %53 : vector<2x1x1xi1>, vector<2x1x1xi32>
      %55 = arith.select %51, %42, %arg5 : vector<2x1x1xi1>, vector<2x1x1xi32>
      %56 = arith.select %51, %arg6, %49 : vector<2x1x1xi1>, vector<2x1x1xi32>
      scf.yield %54, %55, %56 : vector<2x1x1xi32>, vector<2x1x1xi32>, vector<2x1x1xi32>
    }
    %c0_i32_5 = arith.constant 0 : i32
    %12 = vector.broadcast %c0_i32_5 : i32 to vector<2x1x1xi32>
    %13 = arith.cmpi sge, %11#0, %12 : vector<2x1x1xi32>
    %c2147483647_i32_6 = arith.constant 2147483647 : i32
    %14 = vector.broadcast %c2147483647_i32_6 : i32 to vector<2x1x1xi32>
    %15 = arith.xori %11#0, %14 : vector<2x1x1xi32>
    %16 = arith.select %13, %11#0, %15 : vector<2x1x1xi1>, vector<2x1x1xi32>
    %17 = tpu.bitcast %16 : vector<2x1x1xi32> -> vector<2x1x1xf32>
    %18 = vector.broadcast %11#0 : vector<2x1x1xi32> to vector<2x8x128xi32>
    %19 = arith.cmpi slt, %6, %18 : vector<2x8x128xi32>
    %cst = arith.constant 0.000000e+00 : f32
    %20 = vector.broadcast %cst : f32 to vector<2x8x128xf32>
    %21 = arith.select %19, %0, %20 : vector<2x8x128xi1>, vector<2x8x128xf32>
    %cst_7 = arith.constant dense<0.000000e+00> : vector<2x8xf32>
    %22 = vector.multi_reduction <add>, %21, %cst_7 [2] : vector<2x8x128xf32> to vector<2x8xf32>
    %23 = vector.shape_cast %22 : vector<2x8xf32> to vector<2x8x1xf32>
    %cst_8 = arith.constant dense<0.000000e+00> : vector<2x1xf32>
    %24 = vector.multi_reduction <add>, %23, %cst_8 [1] : vector<2x8x1xf32> to vector<2x1xf32>
    %25 = vector.shape_cast %24 : vector<2x1xf32> to vector<2x1x1xf32>
    %c716_i32 = arith.constant 716 : i32
    %26 = vector.broadcast %c716_i32 : i32 to vector<2x1x1xi32>
    %27 = arith.subi %26, %11#2 : vector<2x1x1xi32>
    %28 = arith.sitofp %27 : vector<2x1x1xi32> to vector<2x1x1xf32>
    %29 = arith.mulf %28, %17 : vector<2x1x1xf32>
    %30 = arith.addf %25, %29 : vector<2x1x1xf32>
    %31 = vector.shape_cast %30 : vector<2x1x1xf32> to vector<2x1x1xf32>
    %32 = vector.broadcast %31 : vector<2x1x1xf32> to vector<2x1x128xf32>
    %c0_9 = arith.constant 0 : index
    %c0_10 = arith.constant 0 : index
    %c0_11 = arith.constant 0 : index
    %33 = vector.load %arg2[%c0_9, %c0_10, %c0_11] : memref<2x1x128xf32, #tpu.memory_space<vmem>>, vector<2x1x128xf32>
    tpu.vector_store %arg2[%c0_9, %c0_10, %c0_11], %32 {strides = array<i32>} : memref<2x1x128xf32, #tpu.memory_space<vmem>>, vector<2x1x128xf32>,
    return
  }
  func.func @transform_0(%arg0: i32) -> (i32, i32, i32) {
    %c0_i32 = arith.constant 0 : i32
    %c0_i32_0 = arith.constant 0 : i32
    %c0_i32_1 = arith.constant 0 : i32
    return %arg0, %c0_i32, %c0_i32_0 : i32, i32, i32
  }
  func.func @transform_1(%arg0: i32) -> (i32, i32, i32) {
    %c0_i32 = arith.constant 0 : i32
    %c0_i32_0 = arith.constant 0 : i32
    %c0_i32_1 = arith.constant 0 : i32
    return %arg0, %c0_i32, %c0_i32_0 : i32, i32, i32
  }
}

</mosaic_0001>

<bundles_post_ra>
// kernel: tpu_custom_call.1
= control target key start
LH: loop header
LB: loop body
LE: loop exit
PB: predicated region body
PF: predicated region fallthrough
CT: control target
= control target key end

     0   :  { %6 = vsyncpa [#allocation3], 0  ;;  %s467_s0 = inlined_call_operand.hbm [shape: f32[2,8,128], index: 0, kind: input, shape index: {}]   ;;  %s468_s1 = inlined_call_operand.hbm [shape: f32[2,1,128], index: 1, kind: output, shape index: {}]  }
   0x1   :  { %7 = vsyncpa [#allocation4], 0  ;;  %s352_s6 = smov [#allocation2]   ;;  %s248_s10 = scalar_lea.hbm %s467_s0, 256 }
   0x2   :  { %s13_s7 = sshll.u32 %s352_s6, 4  ;;  %p249_p0 = scmp.ne.s32.totalorder %s467_s0, %s248_s10  ;;  %s14_s7 = int_to_ptr.vmem [resolvable:$true] %s13_s7 }
   0x3   :  { %p252_p1 = scmp.lt.u32.totalorder %s248_s10, %s467_s0 }
   0x5   :  { %p254_p2 = pnand %p252_p1, %p249_p0 }
   0x7   :  { %257 = shalt.err (!%p254_p2)
}
   0x8   :  { %s258_s15 = scalar_lea.vmem %s14_s7, 256  ;;  %p263_p4 = scmp.lt.s32.totalorder %s14_s7, %s14_s7 }
   0x9   :  { %p259_p3 = scmp.ne.s32.totalorder %s14_s7, %s258_s15  ;;  %p264_p5 = scmp.lt.s32.totalorder %s258_s15, %s258_s15 }
   0xb   :  { %p265_p6 = por %p264_p5, %p263_p4 }
   0xd   :  { %p266_p7 = pnand %p265_p6, %p259_p3 }
   0xf   :  { %269 = shalt.err (!%p266_p7)
}
  0x10   :  { %s353_s16 = smov 128   ;;  %s354_s17 = smov 8  }
  0x11   :  { %19 = dma.hbm_to_vmem [thread:$0]  %s467_s0, 256, %s14_s7, [#allocation3], %s353_s16, %s353_s16, %s354_s17  }
  0x12   :  { %320 = dma.done.wait [#allocation3], 256  }
  0x13   :  { %321 = vsyncadd [#allocation3], 4294967040  ;;  %v381_v0 = vld [vmem:[#allocation2] sm:$0xff]  ;;  %v383_v1 = vld [vmem:[#allocation2 + $0x8] sm:$0xff]  ;;  %v395_v6 = vmov 0   ;;  %v397_v7 = vmov 0  }
  0x14   :  { %vm27_vm0 = vcmp.ge.s32.totalorder %v381_v0, 0  ;;  %vm28_vm1 = vcmp.ge.s32.totalorder %v383_v1, 0  ;;  %v29_v2 = vxor.u32 2147483647, %v381_v0  ;;  %v30_v3 = vxor.u32 2147483647, %v383_v1 }
  0x15   :  { %v399_v8 = vmov 2147483647   ;;  %v401_v9 = vmov 2147483647   ;;  %v403_v10 = vmov 2147483648   ;;  %v405_v11 = vmov 2147483648  }
  0x16   :  { %v390_v4 = vsel %vm27_vm0, %v381_v0, %v29_v2  ;;  %v393_v5 = vsel %vm28_vm1, %v383_v1, %v30_v3  ;;  %s407_s0 = smov 0  }
  0x17 LB: > { %v45_v12 = vshra.s32 %v346_v11, 1  ;;  %v47_v13 = vshra.s32 %v338_v9, 1  ;;  %v51_v14 = vand.u32 %v338_v9, %v346_v11  ;;  %v46_v15 = vshra.s32 %v342_v10, 1  ;;  %s38_s0 = sadd.s32 1, %s350_s0   ;;  %s350_s0 = sphi %s407_s0, %s38_s0   ;;  %v346_v11 = vphi %v405_v11, %v472_v11   ;;  %v342_v10 = vphi %v403_v10, %v471_v10   ;;  %v338_v9 = vphi %v401_v9, %v103_v9   ;;  %v334_v8 = vphi %v399_v8, %v104_v8   ;;  %v330_v7 = vphi %v397_v7, %v470_v7   ;;  %v326_v6 = vphi %v395_v6, %v469_v6  }
  0x18   : > { %v48_v16 = vshra.s32 %v334_v8, 1  ;;  %v52_v17 = vand.u32 %v334_v8, %v342_v10  ;;  %v355_v24 = vmov 0   ;;  %p35_p8 = scmp.ge.s32.totalorder %s38_s0, 32  }
  0x19   : > { %v49_v18 = vadd.s32 %v47_v13, %v45_v12  ;;  %v53_v19 = vand.u32 1, %v51_v14  ;;  %s356_s20 = smov (%p35_p8), [#allocation5]  }
  0x1a   : > { %v50_v20 = vadd.s32 %v48_v16, %v46_v15  ;;  %v54_v21 = vand.u32 1, %v52_v17  ;;  %s150_s21 = sshll.u32 (%p35_p8), %s356_s20, 4  ;;  %s151_s21 = int_to_ptr.vmem [resolvable:$true] %s150_s21 }
  0x1b   : > { %v55_v22 = vadd.s32 %v53_v19, %v49_v18  ;;  %s270_s22 = scalar_lea.vmem (%p35_p8), %s151_s21, 32  ;;  %p275_p10 = scmp.lt.s32.totalorder (%p35_p8), %s151_s21, %s151_s21 }
  0x1c   : > { %v56_v23 = vadd.s32 %v54_v21, %v50_v20  ;;  %p271_p9 = scmp.ne.s32.totalorder (%p35_p8), %s151_s21, %s270_s22  ;;  %p276_p11 = scmp.lt.s32.totalorder (%p35_p8), %s270_s22, %s270_s22 }
  0x1d   : > { %vm57_vm2 = vcmp.le.s32.totalorder %v390_v4, %v55_v22  ;;  %v99_v55 = vadd.s32 1, %v55_v22 }
  0x1e   : > { %v59_v25 = vsel %vm57_vm2, 1, %v355_v24  ;;  %vm58_vm3 = vcmp.le.s32.totalorder %v393_v5, %v56_v23  ;;  %v100_v59 = vadd.s32 1, %v56_v23  ;;  %p277_p12 = por (%p35_p8), %p276_p11, %p275_p10 }
  0x1f   : > { %v62_v26 = vshrl.u32 %v59_v25, 16  ;;  %v61_v27 = vand.u32 65535, %v59_v25  ;;  %v60_v28 = vsel %vm58_vm3, 1, %v355_v24 }
  0x20   : > { %v74_v29 = vshrl.u32 %v60_v28, 16  ;;  %v73_v30 = vand.u32 65535, %v60_v28  ;;  %p278_p13 = pnand (%p35_p8), %p277_p12, %p271_p9 }
  0x21   : > { %v64_v31 = vcvt.s32.f32 %v62_v26  ;;  %v63_v32 = vcvt.s32.f32 %v61_v27 }
  0x22   : > { %v76_v33 = vcvt.s32.f32 %v74_v29  ;;  %v75_v34 = vcvt.s32.f32 %v73_v30 }
  0x23   : > { %67 = vadd.xlane.f32.xlu0 %v64_v31  ;;  %65 = vadd.xlane.f32.xlu1 %v63_v32 }
  0x27   : > { %79 = vadd.xlane.f32.xlu0 %v76_v33  ;;  %77 = vadd.xlane.f32.xlu1 %v75_v34 }
  0xb0   : > { %v68_v35 = vpop.xlane.xlu0 %67  ;;  %v66_v36 = vpop.xlane.xlu1 %65 }
  0xb1   : > { %v70_v37 = vcvt.f32.s32 %v68_v35  ;;  %v69_v38 = vcvt.f32.s32 %v66_v36 }
  0xb3   : > { %v71_v39 = vshll.u32 %v70_v37, 16 }
  0xb4   : > { %v80_v40 = vpop.xlane.xlu0 %79  ;;  %v78_v41 = vpop.xlane.xlu1 %77 }
  0xb5   : > { %v72_v42 = vadd.s32 %v71_v39, %v69_v38  ;;  %v82_v43 = vcvt.f32.s32 %v80_v40  ;;  %v81_v44 = vcvt.f32.s32 %v78_v41 }
  0xb7   : > { %v85_v45 = vrot.slane %v72_v42, 4  ;;  %v83_v46 = vshll.u32 %v82_v43, 16 }
  0xb9   : > { %v86_v47 = vadd.s32 %v85_v45, %v72_v42  ;;  %v84_v48 = vadd.s32 %v83_v46, %v81_v44 }
  0xbb   : > { %v87_v49 = vrot.slane %v86_v47, 2  ;;  %v91_v50 = vrot.slane %v84_v48, 4 }
  0xbd   : > { %v88_v51 = vadd.s32 %v87_v49, %v86_v47  ;;  %v92_v52 = vadd.s32 %v91_v50, %v84_v48 }
  0xbf   : > { %v89_v53 = vrot.slane %v88_v51, 1  ;;  %v93_v54 = vrot.slane %v92_v52, 2 }
  0xc1   : > { %v90_v56 = vadd.s32 %v89_v53, %v88_v51  ;;  %v94_v57 = vadd.s32 %v93_v54, %v92_v52 }
  0xc3   : > { %vm97_vm4 = vcmp.ge.s32.totalorder %v90_v56, 716  ;;  %v95_v58 = vrot.slane %v94_v57, 1  ;;  %37 = sbr.rel (!%p35_p8) target bundleno = 23 (0x17), region = 35 }
  0xc4   : > { %v101_v60 = vsel %vm97_vm4, %v346_v11, %v99_v55   ;;  %v103_v9 = vsel %vm97_vm4, %v55_v22, %v338_v9   ;;  %v105_v61 = vsel %vm97_vm4, %v330_v7, %v90_v56  }
  0xc5   : > { %v96_v62 = vadd.s32 %v95_v58, %v94_v57  ;;  %v470_v7 = vmov %v105_v61  ;;  %v472_v11 = vmov %v101_v60  ;;  %vm115_vm6 = vcmp.lt.s32.totalorder (%p35_p8), %v390_v4, %v101_v60 }
  0xc6   :  { %v117_v3 = vsel (%p35_p8), %vm115_vm6, %v381_v0, 0.0  ;;  %v135_v14 = vsub.s32 (%p35_p8), 716, %v105_v61  ;;  %v109_v15 = vxor.u32 (%p35_p8), 2147483647, %v101_v60  ;;  %vm107_vm8 = vcmp.ge.s32.totalorder (%p35_p8), %v101_v60, 0 }
  0xc7   : > { %vm98_vm5 = vcmp.ge.s32.totalorder %v96_v62, 716  ;;  %119 = vadd.xlane.f32.xlu0 (%p35_p8), %v117_v3 }
  0xc8   : > { %v102_v63 = vsel %vm98_vm5, %v342_v10, %v100_v59   ;;  %v104_v8 = vsel %vm98_vm5, %v56_v23, %v334_v8   ;;  %v106_v2 = vsel %vm98_vm5, %v326_v6, %v96_v62   ;;  %v111_v7 = vsel (%p35_p8), %vm107_vm8, %v101_v60, %v109_v15 }
  0xc9   : > { %v469_v6 = vmov %v106_v2  ;;  %v471_v10 = vmov %v102_v63  ;;  %vm116_vm7 = vcmp.lt.s32.totalorder (%p35_p8), %v393_v5, %v102_v63  ;;  %v136_v20 = vsub.s32 (%p35_p8), 716, %v106_v2 }
  0xca   :  { %v118_v11 = vsel %vm116_vm7, %v383_v1, 0.0  ;;  %v137_v6 = vcvt.s32.f32 %v135_v14  ;;  %v110_v4 = vxor.u32 2147483647, %v102_v63  ;;  %vm108_vm9 = vcmp.ge.s32.totalorder %v102_v63, 0 }
  0xcb   :  { %121 = vadd.xlane.f32.xlu0 %v118_v11  ;;  %v138_v1 = vcvt.s32.f32 %v136_v20 }
  0xcc   :  { %v139_v10 = vmul.f32 %v137_v6, %v111_v7  ;;  %v112_v21 = vsel %vm108_vm9, %v102_v63, %v110_v4 }
  0xcd   :  { %v140_v25 = vmul.f32 %v138_v1, %v112_v21 }
 0x154   :  { %v120_v12 = vpop.xlane.xlu0 %119 }
 0x155   :  { %v123_v13 = vrot.slane %v120_v12, 4 }
 0x157   :  { %v124_v16 = vadd.f32 %v123_v13, %v120_v12 }
 0x158   :  { %v122_v17 = vpop.xlane.xlu0 %121 }
 0x159   :  { %v125_v18 = vrot.slane %v124_v16, 2  ;;  %v129_v19 = vrot.slane %v122_v17, 4 }
 0x15b   :  { %v126_v5 = vadd.f32 %v125_v18, %v124_v16  ;;  %v130_v8 = vadd.f32 %v129_v19, %v122_v17 }
 0x15d   :  { %v127_v0 = vrot.slane %v126_v5, 1  ;;  %v131_v9 = vrot.slane %v130_v8, 2 }
 0x15f   :  { %v128_v22 = vadd.f32 %v127_v0, %v126_v5  ;;  %v132_v23 = vadd.f32 %v131_v9, %v130_v8 }
 0x161   :  { %v133_v24 = vrot.slane %v132_v23, 1  ;;  %v141_v26 = vadd.f32 %v139_v10, %v128_v22 }
 0x163   :  { %v134_v27 = vadd.f32 %v133_v24, %v132_v23  ;;  %143 = vst [vmem:[#allocation5] sm:$0x1] %v141_v26 }
 0x165   :  { %v142_v28 = vadd.f32 %v140_v25, %v134_v27 }
 0x167   :  { %144 = vst [vmem:[#allocation5 + $0x1] sm:$0x1] %v142_v28 }
 0x168   :  { %281 = shalt.err (!%p278_p13)
}
 0x169   :  { %s282_s25 = scalar_lea.hbm %s468_s1, 32 }
 0x16a   :  { %p283_p0 = scmp.ne.s32.totalorder %s468_s1, %s282_s25  ;;  %p286_p1 = scmp.lt.u32.totalorder %s282_s25, %s468_s1 }
 0x16c   :  { %p288_p2 = pnand %p286_p1, %p283_p0 }
 0x16e   :  { %291 = shalt.err (!%p288_p2)
}
 0x16f   :  { %s357_s30 = smov 16   ;;  %s358_s2 = smov 1  }
 0x170   :  { %156 = dma.vmem_to_hbm [thread:$0]  %s151_s21, 32, %s468_s1, [#allocation4], %s357_s30, %s357_s30, %s358_s2  }
 0x171   :  { %322 = dma.done.wait [#allocation4], 32  }
 0x172   :  { %323 = vsyncadd [#allocation4], 4294967264 }
 0x173   :  { %160 = vsyncpa [#allocation3], 1 }
 0x174   :  { %161 = vsyncpa [#allocation4], 1 }

</bundles_post_ra>
